<compile_context>
chip_gen: v5e
topology: v5e:2x2
jax: 0.10.0
libtpu: 0.0.40
codegen_flags: <defaults>
</compile_context>

<pallas_src>
import numpy as np
import jax
import jax.numpy as jnp
from jax.experimental import pallas as pl
from jax.experimental.pallas import tpu as pltpu


def _round_up(x, m):
    return (x + m - 1) // m * m


def _choose_m_tiling(m, target, sublane):
    """Pick (tm, m_padded): tm multiple of `sublane`, tm | m_padded, tm <= target.

    Prefers an exact divisor of the minimally padded M (no wasted rows) and
    >= 2 grid steps so a v7x dual-TensorCore 'parallel' axis has work for both
    cores; falls back to padding M up to a multiple of the target tile when M
    only has tiny divisors (avoids thousands of 8-row grid steps).
    """
    m_min = _round_up(max(m, sublane), sublane)
    cap = min(target, m_min)
    if m_min // 2 >= sublane:
        cap = min(cap, _round_up(m_min // 2, sublane))
    cap -= cap % sublane
    cap = max(cap, sublane)

    best = sublane
    for cand in range(cap, sublane - 1, -sublane):
        if m_min % cand == 0:
            best = cand
            break
    if best >= max(cap // 2, sublane):
        return best, m_min                     # exact divisor, no row padding
    return cap, _round_up(m_min, cap)          # pad rows, keep big tiles


# ----------------------------------------------------------------------------
# Pallas kernel: fused relu(x_tile @ W) — one MXU matmul + VPU relu per tile.
# ----------------------------------------------------------------------------
def _relu_matmul_kernel(x_ref, w_ref, o_ref):
    # x_ref: (tm, F_in)   w_ref: (F_in, Fo_p)   o_ref: (tm, Fo_p)
    acc = jnp.dot(x_ref[...], w_ref[...], preferred_element_type=jnp.float32)  # MXU
    o_ref[...] = jnp.maximum(acc, 0.0).astype(o_ref.dtype)                     # VPU relu


def relu_matmul_padded_weight(x2d, w_padded, *, n_out, out_dtype=None, tm_target=512):
    """relu(x2d @ w_padded)[:, :n_out] via a single row-tiled Pallas call.

    `w_padded` is already lane-padded (last dim a multiple of 128) and in the
    desired MXU-input dtype.  x2d is cast to that dtype; its feature dim is NOT
    padded in HBM (block last dim == full array dim is legal; Mosaic pads K
    inside vregs for the matmul).
    """
    m, f_in = x2d.shape
    f_in_w, fo_p = w_padded.shape
    assert f_in_w == f_in, (f_in_w, f_in)
    assert fo_p % 128 == 0

    compute_dtype = w_padded.dtype
    if out_dtype is None:
        out_dtype = x2d.dtype

    sublane = 16 if compute_dtype == jnp.bfloat16 else 8   # bf16 packs 2 rows/sublane
    tm, mp = _choose_m_tiling(m, tm_target, sublane)

    x_in = x2d.astype(compute_dtype)
    if mp != m:
        # Row-only pad (lane dim untouched); zero rows stay zero through relu.
        x_in = jnp.zeros((mp, f_in), compute_dtype).at[:m, :].set(x_in)

    grid = (mp // tm,)

    in_itemsize = jnp.dtype(compute_dtype).itemsize
    out_itemsize = jnp.dtype(out_dtype).itemsize
    cost = pl.CostEstimate(
        flops=2 * mp * f_in * fo_p,
        transcendentals=0,
        bytes_accessed=(mp * f_in + f_in * fo_p) * in_itemsize
        + mp * fo_p * out_itemsize,
    )
    # Double-buffered x/out tiles + (worst-case double-buffered) weight + slack
    # for compiler-internal scratch.  Capped below v7x's 64 MiB physical VMEM.
    vmem_need = (
        2 * tm * f_in * in_itemsize
        + 2 * f_in * fo_p * in_itemsize
        + 2 * tm * fo_p * out_itemsize
        + tm * fo_p * 4
    )
    vmem_limit = int(min(vmem_need + 8 * 1024 * 1024, 64 * 1024 * 1024))
    # TODO(synk): for very large F_in/F_out (>~2K) add a K/N grid with a VMEM
    # f32 accumulator (pl.when init/finalize) so the full weight need not be
    # resident; unnecessary at these feature sizes.

    def _build_and_run(single_buffer_weight):
        w_spec_kwargs = (
            {"pipeline_mode": pl.Buffered(1)} if single_buffer_weight else {}
        )
        return pl.pallas_call(
            _relu_matmul_kernel,
            out_shape=jax.ShapeDtypeStruct((mp, fo_p), out_dtype),
            grid_spec=pltpu.PrefetchScalarGridSpec(
                num_scalar_prefetch=0,
                grid=grid,
                in_specs=[
                    pl.BlockSpec((tm, f_in), lambda i: (i, 0)),        # x row tile
                    pl.BlockSpec((f_in, fo_p), lambda i: (0, 0),       # shared weight
                                 **w_spec_kwargs),
                ],
                out_specs=pl.BlockSpec((tm, fo_p), lambda i: (i, 0)),  # lane-dense out
            ),
            compiler_params=pltpu.CompilerParams(
                dimension_semantics=("parallel",),
                vmem_limit_bytes=vmem_limit,
            ),
            cost_estimate=cost,
        )(x_in, w_padded)

    try:
        # Weight index_map is grid-invariant: single VMEM buffer halves its residency.
        out_p = _build_and_run(True)
    except Exception:
        # Fallback for JAX builds without BlockSpec.pipeline_mode support.
        out_p = _build_and_run(False)

    # Slice off padding only when it exists (skip redundant copies when aligned).
    if mp != m:
        out_p = out_p[:m]
    if fo_p != n_out:
        out_p = out_p[:, :n_out]
    return out_p


# ----------------------------------------------------------------------------
# Glue: Chebyshev support generation (only builds what is requested) + module.
# ----------------------------------------------------------------------------
def generate_cheby_adj(L, K, num_needed=None):
    """DGCNN-style supports [I, L, L@L, ...]; only `num_needed` are built."""
    n = L.shape[-1]
    k_build = K if num_needed is None else min(K, num_needed)
    support = []
    for i in range(k_build):
        if i == 0:
            support.append(jnp.eye(n, dtype=L.dtype))
        elif i == 1:
            support.append(L)
        else:
            support.append(jnp.matmul(support[-1], L))
    return support


class ChebynetPallas:
    """Mirrors the PyTorch Chebynet: one GraphConvolution(xdim[2], num_out) + relu.

    compute_dtype=jnp.bfloat16 feeds the MXU bf16 inputs with f32 accumulation
    (recommended on v6e/v7x); the default jnp.float32 keeps the f32-exact path.
    """

    def __init__(self, xdim, K, num_out, dropout, key, compute_dtype=jnp.float32):
        self.K = K
        self.num_out = num_out
        self.compute_dtype = compute_dtype
        f_in = xdim[2]
        # xavier_normal_-style init; GraphConvolution is assumed bias-free.
        std = float(np.sqrt(2.0 / (f_in + num_out)))
        self.weight = jax.random.normal(key, (f_in, num_out), dtype=jnp.float32) * std
        # Lane-pad + cast the constant weight ONCE (not per forward call).
        # v6e/v7x MXU tiles are 256 wide, so pad to 256 once F_out exceeds 128.
        fo_p = _round_up(num_out, 256 if num_out > 128 else 128)
        w_c = self.weight.astype(compute_dtype)
        if fo_p == num_out:
            self.weight_padded = w_c
        else:
            self.weight_padded = (
                jnp.zeros((f_in, fo_p), compute_dtype).at[:, :num_out].set(w_c)
            )
        # TODO(synk): self.dp (nn.Dropout) exists in the PyTorch module but is
        # never applied in its forward, so it is intentionally not implemented.

    def forward(self, x, L):
        B, N, F_in = x.shape
        # The reference forward uses only adj[0] (len(gc1) == 1) and adj[0] == I,
        # so (adj[0] @ x) @ W == x @ W exactly; no supports are materialized and
        # the identity matmul is elided.
        _ = generate_cheby_adj(L, self.K, num_needed=0)  # structural fidelity only
        out2d = relu_matmul_padded_weight(
            x.reshape(B * N, F_in),
            self.weight_padded,
            n_out=self.num_out,
            out_dtype=x.dtype,
        )
        return out2d.reshape(B, N, self.num_out)


if __name__ == "__main__":
    key = jax.random.PRNGKey(0)
    k_x, k_L, k_w = jax.random.split(key, 3)

    B, N, F_in, F_out, K = 2, 16, 8, 32, 3
    xdim = (B, N, F_in)

    x = jax.random.normal(k_x, (B, N, F_in), dtype=jnp.float32)
    L = jax.random.normal(k_L, (N, N), dtype=jnp.float32)
    L = 0.5 * (L + L.T)  # symmetric "Laplacian"-like input

    # --- f32 path (default): matches PyTorch semantics relu((adj[0] @ x) @ W). ---
    model = ChebynetPallas(xdim, K=K, num_out=F_out, dropout=0.5, key=k_w)
    out = jax.block_until_ready(model.forward(x, L))

    x_np = np.asarray(x, dtype=np.float32).reshape(B * N, F_in)
    w_np = np.asarray(model.weight, dtype=np.float32)
    ref = np.maximum(x_np @ w_np, 0.0).reshape(B, N, F_out)
    np.testing.assert_allclose(np.asarray(out), ref, rtol=1e-4, atol=1e-5)

    # --- bf16 MXU-input path (v6e/v7x recommendation): f32 accumulation. ---
    model_bf16 = ChebynetPallas(
        xdim, K=K, num_out=F_out, dropout=0.5, key=k_w, compute_dtype=jnp.bfloat16
    )
    out_bf16 = jax.block_until_ready(model_bf16.forward(x, L))
    ref_bf16 = np.asarray(
        jnp.maximum(
            jnp.dot(
                x.reshape(B * N, F_in).astype(jnp.bfloat16),
                model_bf16.weight.astype(jnp.bfloat16),
                preferred_element_type=jnp.float32,
            ),
            0.0,
        )
    ).reshape(B, N, F_out)
    np.testing.assert_allclose(np.asarray(out_bf16), ref_bf16, rtol=2e-2, atol=2e-2)

    print("KERNEL_OK")
</pallas_src>

<mosaic_0001>
module attributes {stable_mosaic.version = 11 : i64} {
  func.func @_relu_matmul_kernel(%arg0: i32, %arg1: memref<16x8xf32, #tpu.memory_space<vmem>>, %arg2: memref<8x128xf32, #tpu.memory_space<vmem>>, %arg3: memref<16x128xf32, #tpu.memory_space<vmem>>) attributes {dimension_semantics = [#tpu.dimension_semantics<parallel>], iteration_bounds = array<i64: 2>, scalar_prefetch = 0 : i64, scratch_operands = 0 : i64, tpu.core_type = #tpu.core_type<tc>, window_params = [{transform_indices = @transform_0, window_bounds = array<i64: 16, 8>}, {pipeline_mode = #tpu.pipeline_mode<synchronous>, transform_indices = @transform_1, window_bounds = array<i64: 8, 128>}, {transform_indices = @transform_2, window_bounds = array<i64: 16, 128>}]} {
    %c0 = arith.constant 0 : index
    %c0_0 = arith.constant 0 : index
    %0 = vector.load %arg1[%c0, %c0_0] : memref<16x8xf32, #tpu.memory_space<vmem>>, vector<16x8xf32>
    %c0_1 = arith.constant 0 : index
    %c0_2 = arith.constant 0 : index
    %1 = vector.load %arg2[%c0_1, %c0_2] : memref<8x128xf32, #tpu.memory_space<vmem>>, vector<8x128xf32>
    %cst = arith.constant dense<0.000000e+00> : vector<16x128xf32>
    %2 = tpu.matmul %0, %1, %cst {dimension_numbers = #tpu.dot_dimension_numbers<[1], [0], [0], [1], [0, 0, 1, 1], [], []>} : vector<16x8xf32>, vector<8x128xf32>, vector<16x128xf32> -> vector<16x128xf32>
    %cst_3 = arith.constant 0.000000e+00 : f32
    %3 = vector.broadcast %cst_3 : f32 to vector<16x128xf32>
    %4 = arith.maximumf %2, %3 : vector<16x128xf32>
    %c0_4 = arith.constant 0 : index
    %c0_5 = arith.constant 0 : index
    %5 = vector.load %arg3[%c0_4, %c0_5] : memref<16x128xf32, #tpu.memory_space<vmem>>, vector<16x128xf32>
    tpu.vector_store %arg3[%c0_4, %c0_5], %4 {strides = array<i32>} : memref<16x128xf32, #tpu.memory_space<vmem>>, vector<16x128xf32>,
    return
  }
  func.func @transform_0(%arg0: i32) -> (i32, i32) {
    %c0_i32 = arith.constant 0 : i32
    %c0_i32_0 = arith.constant 0 : i32
    return %arg0, %c0_i32 : i32, i32
  }
  func.func @transform_1(%arg0: i32) -> (i32, i32) {
    %c0_i32 = arith.constant 0 : i32
    %c0_i32_0 = arith.constant 0 : i32
    %c0_i32_1 = arith.constant 0 : i32
    return %c0_i32, %c0_i32_0 : i32, i32
  }
  func.func @transform_2(%arg0: i32) -> (i32, i32) {
    %c0_i32 = arith.constant 0 : i32
    %c0_i32_0 = arith.constant 0 : i32
    return %arg0, %c0_i32 : i32, i32
  }
}

module attributes {stable_mosaic.version = 11 : i64} {
  func.func @_relu_matmul_kernel(%arg0: i32, %arg1: memref<16x8xf32, #tpu.memory_space<vmem>>, %arg2: memref<8x128xf32, #tpu.memory_space<vmem>>, %arg3: memref<16x128xf32, #tpu.memory_space<vmem>>) attributes {dimension_semantics = [#tpu.dimension_semantics<parallel>], iteration_bounds = array<i64: 2>, scalar_prefetch = 0 : i64, scratch_operands = 0 : i64, tpu.core_type = #tpu.core_type<tc>, window_params = [{transform_indices = @transform_0, window_bounds = array<i64: 16, 8>}, {pipeline_mode = #tpu.pipeline_mode<synchronous>, transform_indices = @transform_1, window_bounds = array<i64: 8, 128>}, {transform_indices = @transform_2, window_bounds = array<i64: 16, 128>}]} {
    %c0 = arith.constant 0 : index
    %c0_0 = arith.constant 0 : index
    %0 = vector.load %arg1[%c0, %c0_0] : memref<16x8xf32, #tpu.memory_space<vmem>>, vector<16x8xf32>
    %c0_1 = arith.constant 0 : index
    %c0_2 = arith.constant 0 : index
    %1 = vector.load %arg2[%c0_1, %c0_2] : memref<8x128xf32, #tpu.memory_space<vmem>>, vector<8x128xf32>
    %cst = arith.constant dense<0.000000e+00> : vector<16x128xf32>
    %2 = tpu.matmul %0, %1, %cst {dimension_numbers = #tpu.dot_dimension_numbers<[1], [0], [0], [1], [0, 0, 1, 1], [], []>} : vector<16x8xf32>, vector<8x128xf32>, vector<16x128xf32> -> vector<16x128xf32>
    %cst_3 = arith.constant 0.000000e+00 : f32
    %3 = vector.broadcast %cst_3 : f32 to vector<16x128xf32>
    %4 = arith.maximumf %2, %3 : vector<16x128xf32>
    %c0_4 = arith.constant 0 : index
    %c0_5 = arith.constant 0 : index
    %5 = vector.load %arg3[%c0_4, %c0_5] : memref<16x128xf32, #tpu.memory_space<vmem>>, vector<16x128xf32>
    tpu.vector_store %arg3[%c0_4, %c0_5], %4 {strides = array<i32>} : memref<16x128xf32, #tpu.memory_space<vmem>>, vector<16x128xf32>,
    return
  }
  func.func @transform_0(%arg0: i32) -> (i32, i32) {
    %c0_i32 = arith.constant 0 : i32
    %c0_i32_0 = arith.constant 0 : i32
    return %arg0, %c0_i32 : i32, i32
  }
  func.func @transform_1(%arg0: i32) -> (i32, i32) {
    %c0_i32 = arith.constant 0 : i32
    %c0_i32_0 = arith.constant 0 : i32
    %c0_i32_1 = arith.constant 0 : i32
    return %c0_i32, %c0_i32_0 : i32, i32
  }
  func.func @transform_2(%arg0: i32) -> (i32, i32) {
    %c0_i32 = arith.constant 0 : i32
    %c0_i32_0 = arith.constant 0 : i32
    return %arg0, %c0_i32 : i32, i32
  }
}

</mosaic_0001>

<bundles_post_ra>
// kernel: tpu_custom_call.1
= control target key start
LH: loop header
LB: loop body
LE: loop exit
PB: predicated region body
PF: predicated region fallthrough
CT: control target
= control target key end

     0   :  { %7 = vsyncpa [#allocation3], 0  ;;  %s485_s0 = inlined_call_operand.vmem [shape: f32[32,8], index: 0, kind: input, shape index: {}]   ;;  %s486_s1 = inlined_call_operand.vmem [shape: f32[8,128], index: 1, kind: input, shape index: {}]   ;;  %s487_s2 = inlined_call_operand.hbm [shape: f32[32,128], index: 2, kind: output, shape index: {}]  }
   0x1   :  { %9 = vsyncpa [#allocation3 + $0x1], 0  ;;  %s398_s9 = smov 0   ;;  %s400_s10 = smov 0  }
   0x2   :  { %s402_s11 = smov 0   ;;  %s404_s12 = smov 0  }
   0x3 LB: > { %s419_s13 = sadd.s32 4294967295, %s379_s12   ;;  %s260_s14 = sadd.s32 4294967294, %s379_s12   ;;  %s379_s12 = sphi %s404_s12, %s493_s12   ;;  %s375_s11 = sphi %s402_s11, %s492_s11   ;;  %s371_s10 = sphi %s400_s10, %s491_s10   ;;  %s367_s9 = sphi %s398_s9, %s490_s9  }
   0x4   : > { %s423_s15 = sadd.s32 1, %s379_s12   ;;  %s69_s16 = sadd.s32 1, %s375_s11 }
   0x5   : > { %s66_s17 = ssub.s32 %s379_s12, %s423_s15  ;;  %p79_p0 = scmp.ne.s32.totalorder %s375_s11, %s371_s10 }
   0x6   : > { %p67_p1 = scmp.eq.s32.totalorder %s66_s17, 0  ;;  %p80_p2 = scmp.eq.s32.totalorder %s419_s13, 1 }
   0x7   : > { %p85_p3 = scmp.ne.s32.totalorder %s371_s10, %s367_s9  ;;  %p86_p4 = scmp.eq.s32.totalorder %s260_s14, 1 }
   0x8   : > { %s434_s18 = scalar_select %p67_p1, %s375_s11, %s69_s16  }
   0x9   : > { %p436_p5 = por %p80_p2, %p79_p0  ;;  %p440_p6 = por %p86_p4, %p85_p3 }
   0xa   : > { %p263_p7 = scmp.ge.s32.totalorder %s379_s12, 1  ;;  %p116_p8 = scmp.lt.s32.totalorder %s379_s12, 3 }
   0xc   : > { %p117_p9 = pnand %p263_p7, %p116_p8 }
   0xd   : > { %s265_s23 = sshll.u32 (!%p117_p9), %s419_s13, 1  ;;  %s135_s28 = sand.u32 (!%p117_p9), 1, %s371_s10  }
   0xe   : > { %120 = sbr.rel (%p117_p9) target bundleno = 156 (0x9c), region = 28  ;;  %p139_p10 = scmp.lt.s32.totalorder (!%p117_p9), %s265_s23, 3 }
   0xf   : > { %s264_s29 = sshll.u32 (!%p117_p9), %s135_s28, 4  ;;  %s274_s30 = sshll.u32 (!%p117_p9), %s419_s13, 4 }
  0x10   : > { %s194_s5 = scalar_lea.hbm (!%p117_p9), %s487_s2, %s274_s30  ;;  %s137_s6 = scalar_lea.vmem (!%p117_p9), [#allocation2], %s264_s29 }
  0x11   : > { %s195_s7 = sshll.u32 (!%p117_p9), %s137_s6, 4  ;;  %s197_s8 = sshll.u32 (!%p117_p9), %s194_s5, 4  ;;  %s196_s7 = int_to_ptr.vmem [resolvable:$true] %s195_s7  ;;  %s198_s8 = int_to_ptr.hbm [resolvable:$true] %s197_s8 }
  0x12   : > { %s183_s14 = scalar_lea.sflag (!%p117_p9), [#allocation3], %s135_s28  ;;  %s331_s16 = sshra.s32 (!%p117_p9), %s198_s8, 4  ;;  %s332_s16 = int_to_ptr.hbm [resolvable:$true] %s331_s16 }
  0x13   : > { %v147_v0 = vld [vmem:[%s486_s1] sm:$0xff]  ;;  %s495_s23 = smov (!%p139_p10, %s265_s23), 3  ;;  %vm148_vm0 = vcmask 64512   ;;  %s333_s13 = scalar_lea.hbm %s332_s16, 16 }
  0x14   : > { %170 = vmatpush.msra.mxu0 %v147_v0  ;;  %275 = vmatpush.msra.mxu1 %v147_v0  ;;  %s266_s24 = sshll.u32 %s495_s23, 3  ;;  %p334_p11 = scmp.ne.s32.totalorder %s332_s16, %s333_s13 }
  0x15   : > { %s142_s27 = scalar_lea.vmem %s485_s0, %s266_s24  ;;  %s337_s22 = scalar_lea.hbm %s487_s2, 32 }
  0x16   : > { %v145_v1 = vld [vmem:[%s142_s27] sm:$0xff]  ;;  %v146_v2 = vld [vmem:[%s142_s27 + $0x8] sm:$0xff]  ;;  %p335_p12 = pnand %p334_p11, %p436_p5  ;;  %p338_p0 = scmp.lt.s32.totalorder %s332_s16, %s487_s2 }
  0x17   : > { %267 = vmatmul.msk.f32.vlgmr.msra.gmra.mxu0 %vm148_vm0, %v145_v1  ;;  %268 = vmatmul.msk.f32.vlgmr.msra.gmra.mxu1 %vm148_vm0, %v146_v2  ;;  %p339_p1 = scmp.lt.s32.totalorder %s337_s22, %s333_s13 }
  0x18   : > { %p336_p13 = pneg %p335_p12 }
  0x19   : > { %p340_p2 = por %p339_p1, %p338_p0 }
  0x1b   : > { %p341_p3 = pnand %p340_p2, %p336_p13 }
  0x94   : > { %v172_v3 = vpop.f32.mrf.mxu0  ;;  %v175_v4 = vpop.f32.mrf.mxu1 }
  0x95   : > { %v178_v5 = vmax.f32 %v172_v3, 0.0  ;;  %v179_v6 = vmax.f32 %v175_v4, 0.0 }
  0x97   : > { %180 = vst [vmem:[%s137_s6] sm:$0xff] %v178_v5 }
  0x98   : > { %181 = vst [vmem:[%s137_s6 + $0x8] sm:$0xff] %v179_v6 }
  0x99   : > { %344 = shalt.err (!%p341_p3)
}
  0x9a   : > { %s381_s25 = smov 128   ;;  %s382_s26 = smov 8  }
  0x9b   : > { %276 = dma.vmem_to_hbm [thread:$0]  (%p436_p5), %s196_s7, 256, %s198_s8, %s183_s14, %s381_s25, %s381_s25, %s382_s26  }
  0x9c PF: > { %p282_p4 = scmp.ge.s32.totalorder %s379_s12, 2  ;;  %s212_s27 = sand.u32 1, %s367_s9  }
  0x9d   : > { %s213_s28 = scalar_lea.sflag [#allocation3], %s212_s27 }
  0x9e   : > { %p279_p7 = pnand %p282_p4, %p440_p6 }
  0xa0   : > { %p280_p8 = pneg %p279_p7 }
  0xa2   : > { %362 = dma.done.wait (%p280_p8), %s213_s28, 256  }
  0xa3   : > { %364 = vsyncadd (%p280_p8), %s213_s28, 4294967040  ;;  %p12_p9 = scmp.ge.s32.totalorder %s423_s15, 4   ;;  %s490_s9 = smov %s371_s10 }
  0xa4   : > { %s491_s10 = smov %s375_s11  ;;  %s492_s11 = smov %s434_s18 }
  0xa5   : > { %s493_s12 = smov %s423_s15  ;;  %14 = sbr.rel (!%p12_p9) target bundleno = 3 (0x3), region = 63 }
  0xaa   :  { %219 = vsyncpa [#allocation3], 1 }
  0xab   :  { %221 = vsyncpa [#allocation3 + $0x1], 1 }

// kernel: tpu_custom_call.1
= control target key start
LH: loop header
LB: loop body
LE: loop exit
PB: predicated region body
PF: predicated region fallthrough
CT: control target
= control target key end

     0   :  { %7 = vsyncpa [#allocation3], 0  ;;  %s485_s0 = inlined_call_operand.vmem [shape: f32[32,8], index: 0, kind: input, shape index: {}]   ;;  %s486_s1 = inlined_call_operand.vmem [shape: f32[8,128], index: 1, kind: input, shape index: {}]   ;;  %s487_s2 = inlined_call_operand.hbm [shape: f32[32,128], index: 2, kind: output, shape index: {}]  }
   0x1   :  { %9 = vsyncpa [#allocation3 + $0x1], 0  ;;  %s398_s9 = smov 0   ;;  %s400_s10 = smov 0  }
   0x2   :  { %s402_s11 = smov 0   ;;  %s404_s12 = smov 0  }
   0x3 LB: > { %s419_s13 = sadd.s32 4294967295, %s379_s12   ;;  %s260_s14 = sadd.s32 4294967294, %s379_s12   ;;  %s379_s12 = sphi %s404_s12, %s493_s12   ;;  %s375_s11 = sphi %s402_s11, %s492_s11   ;;  %s371_s10 = sphi %s400_s10, %s491_s10   ;;  %s367_s9 = sphi %s398_s9, %s490_s9  }
   0x4   : > { %s423_s15 = sadd.s32 1, %s379_s12   ;;  %s69_s16 = sadd.s32 1, %s375_s11 }
   0x5   : > { %s66_s17 = ssub.s32 %s379_s12, %s423_s15  ;;  %p79_p0 = scmp.ne.s32.totalorder %s375_s11, %s371_s10 }
   0x6   : > { %p67_p1 = scmp.eq.s32.totalorder %s66_s17, 0  ;;  %p80_p2 = scmp.eq.s32.totalorder %s419_s13, 1 }
   0x7   : > { %p85_p3 = scmp.ne.s32.totalorder %s371_s10, %s367_s9  ;;  %p86_p4 = scmp.eq.s32.totalorder %s260_s14, 1 }
   0x8   : > { %s434_s18 = scalar_select %p67_p1, %s375_s11, %s69_s16  }
   0x9   : > { %p436_p5 = por %p80_p2, %p79_p0  ;;  %p440_p6 = por %p86_p4, %p85_p3 }
   0xa   : > { %p263_p7 = scmp.ge.s32.totalorder %s379_s12, 1  ;;  %p116_p8 = scmp.lt.s32.totalorder %s379_s12, 3 }
   0xc   : > { %p117_p9 = pnand %p263_p7, %p116_p8 }
   0xd   : > { %s265_s23 = sshll.u32 (!%p117_p9), %s419_s13, 1  ;;  %s135_s28 = sand.u32 (!%p117_p9), 1, %s371_s10  }
   0xe   : > { %120 = sbr.rel (%p117_p9) target bundleno = 156 (0x9c), region = 28  ;;  %p139_p10 = scmp.lt.s32.totalorder (!%p117_p9), %s265_s23, 3 }
   0xf   : > { %s264_s29 = sshll.u32 (!%p117_p9), %s135_s28, 4  ;;  %s274_s30 = sshll.u32 (!%p117_p9), %s419_s13, 4 }
  0x10   : > { %s194_s5 = scalar_lea.hbm (!%p117_p9), %s487_s2, %s274_s30  ;;  %s137_s6 = scalar_lea.vmem (!%p117_p9), [#allocation2], %s264_s29 }
  0x11   : > { %s195_s7 = sshll.u32 (!%p117_p9), %s137_s6, 4  ;;  %s197_s8 = sshll.u32 (!%p117_p9), %s194_s5, 4  ;;  %s196_s7 = int_to_ptr.vmem [resolvable:$true] %s195_s7  ;;  %s198_s8 = int_to_ptr.hbm [resolvable:$true] %s197_s8 }
  0x12   : > { %s183_s14 = scalar_lea.sflag (!%p117_p9), [#allocation3], %s135_s28  ;;  %s331_s16 = sshra.s32 (!%p117_p9), %s198_s8, 4  ;;  %s332_s16 = int_to_ptr.hbm [resolvable:$true] %s331_s16 }
  0x13   : > { %v147_v0 = vld [vmem:[%s486_s1] sm:$0xff]  ;;  %s495_s23 = smov (!%p139_p10, %s265_s23), 3  ;;  %vm148_vm0 = vcmask 64512   ;;  %s333_s13 = scalar_lea.hbm %s332_s16, 16 }
  0x14   : > { %170 = vmatpush.msra.mxu0 %v147_v0  ;;  %275 = vmatpush.msra.mxu1 %v147_v0  ;;  %s266_s24 = sshll.u32 %s495_s23, 3  ;;  %p334_p11 = scmp.ne.s32.totalorder %s332_s16, %s333_s13 }
  0x15   : > { %s142_s27 = scalar_lea.vmem %s485_s0, %s266_s24  ;;  %s337_s22 = scalar_lea.hbm %s487_s2, 32 }
  0x16   : > { %v145_v1 = vld [vmem:[%s142_s27] sm:$0xff]  ;;  %v146_v2 = vld [vmem:[%s142_s27 + $0x8] sm:$0xff]  ;;  %p335_p12 = pnand %p334_p11, %p436_p5  ;;  %p338_p0 = scmp.lt.s32.totalorder %s332_s16, %s487_s2 }
  0x17   : > { %267 = vmatmul.msk.f32.vlgmr.msra.gmra.mxu0 %vm148_vm0, %v145_v1  ;;  %268 = vmatmul.msk.f32.vlgmr.msra.gmra.mxu1 %vm148_vm0, %v146_v2  ;;  %p339_p1 = scmp.lt.s32.totalorder %s337_s22, %s333_s13 }
  0x18   : > { %p336_p13 = pneg %p335_p12 }
  0x19   : > { %p340_p2 = por %p339_p1, %p338_p0 }
  0x1b   : > { %p341_p3 = pnand %p340_p2, %p336_p13 }
  0x94   : > { %v172_v3 = vpop.f32.mrf.mxu0  ;;  %v175_v4 = vpop.f32.mrf.mxu1 }
  0x95   : > { %v178_v5 = vmax.f32 %v172_v3, 0.0  ;;  %v179_v6 = vmax.f32 %v175_v4, 0.0 }
  0x97   : > { %180 = vst [vmem:[%s137_s6] sm:$0xff] %v178_v5 }
  0x98   : > { %181 = vst [vmem:[%s137_s6 + $0x8] sm:$0xff] %v179_v6 }
  0x99   : > { %344 = shalt.err (!%p341_p3)
}
  0x9a   : > { %s381_s25 = smov 128   ;;  %s382_s26 = smov 8  }
  0x9b   : > { %276 = dma.vmem_to_hbm [thread:$0]  (%p436_p5), %s196_s7, 256, %s198_s8, %s183_s14, %s381_s25, %s381_s25, %s382_s26  }
  0x9c PF: > { %p282_p4 = scmp.ge.s32.totalorder %s379_s12, 2  ;;  %s212_s27 = sand.u32 1, %s367_s9  }
  0x9d   : > { %s213_s28 = scalar_lea.sflag [#allocation3], %s212_s27 }
  0x9e   : > { %p279_p7 = pnand %p282_p4, %p440_p6 }
  0xa0   : > { %p280_p8 = pneg %p279_p7 }
  0xa2   : > { %362 = dma.done.wait (%p280_p8), %s213_s28, 256  }
  0xa3   : > { %364 = vsyncadd (%p280_p8), %s213_s28, 4294967040  ;;  %p12_p9 = scmp.ge.s32.totalorder %s423_s15, 4   ;;  %s490_s9 = smov %s371_s10 }
  0xa4   : > { %s491_s10 = smov %s375_s11  ;;  %s492_s11 = smov %s434_s18 }
  0xa5   : > { %s493_s12 = smov %s423_s15  ;;  %14 = sbr.rel (!%p12_p9) target bundleno = 3 (0x3), region = 63 }
  0xaa   :  { %219 = vsyncpa [#allocation3], 1 }
  0xab   :  { %221 = vsyncpa [#allocation3 + $0x1], 1 }

</bundles_post_ra>
